<compile_context>
chip_gen: v7x
topology: tpu7x:2x2x1
jax: 0.10.0
libtpu: 0.0.40
codegen_flags: <defaults>
</compile_context>

<pallas_src>
import functools

import jax
import jax.numpy as jnp
import numpy as np
from jax.experimental import pallas as pl
from jax.experimental.pallas import tpu as pltpu


# ---------------------------------------------------------------------------
# Fused kernel: 1x1 conv + BN + ReLU  ->  depthwise 3x3 + BN + ReLU6  -> cat
# ---------------------------------------------------------------------------
def _ghost_fused_kernel(x_ref, w1_ref, b1_ref, wd_ref, b2_ref, m_ref, o_ref,
                        *, W, s, use_mxu):
    # x_ref : (nb, Cin, HW)  input block (channels on sublanes, H*W on lanes)
    # w1_ref: (Cint, Cin)    1x1 conv weights, BN1 scale folded (bf16 if MXU)
    # b1_ref: (Cint, 1)      folded BN1 bias (f32)
    # wd_ref: (G, 9)         depthwise taps (row-major dy,dx), BN2 scale folded
    # b2_ref: (G, 1)         folded BN2 bias (f32)
    # m_ref : (4, HW)        0/1 border masks [r>=1, r<=H-2, c>=1, c<=W-2]
    # o_ref : (nb, Cint+G, HW)
    nb, cin, hw = x_ref.shape
    cint = w1_ref.shape[0]

    # Resident operands: load once per grid step, hoisted out of the image loop.
    w1 = w1_ref[...]
    b1 = b1_ref[...]
    wd = wd_ref[...]
    b2 = b2_ref[...]
    masks = m_ref[...]
    m_top, m_bot = masks[0:1, :], masks[1:2, :]
    m_lft, m_rgt = masks[2:3, :], masks[3:4, :]

    def w9(k):                                   # (G, 1) tap-k weight column
        return wd[:, k:k + 1]

    for n in range(nb):                          # nb is a small static unroll
        xn = x_ref[n]                            # (Cin, HW)

        # ---- primary_conv: 1x1 conv + folded BN + ReLU --------------------
        if use_mxu:
            # bf16 operands, f32 accumulate (MXU peak dtype on v6e/v7x).
            y = jnp.dot(w1, xn.astype(w1.dtype),
                        preferred_element_type=jnp.float32)
        else:
            # Tiny Cin: Cin VPU FMAs (rank-1 outer products) instead of a
            # ~3%-occupied MXU pass; stays f32 (optimal on v5e too).
            y = w1[:, 0:1] * xn[0:1, :]
            for c in range(1, cin):
                y = y + w1[:, c:c + 1] * xn[c:c + 1, :]
        y = jnp.maximum(y + b1, 0.0)             # (Cint, HW) f32

        # ---- ghost-channel expansion (identity for s=2) --------------------
        yg = y if s == 2 else jnp.repeat(y, s - 1, axis=0)   # (G, HW)

        # ---- cheap_op: depthwise 3x3 (stride 1, pad 1) + BN + ReLU6 --------
        # Row-shifted planes via XLU rolls; the precomputed 0/1 row masks both
        # zero-pad the top/bottom borders and cancel the roll wrap-around.
        s_up = m_top * pltpu.roll(yg, W, 1)          # reads row r-1
        s_dn = m_bot * pltpu.roll(yg, hw - W, 1)     # reads row r+1
        # Sum the three dy taps per column group, roll each group once for its
        # column shift, and apply the column mask once per group.
        g_l = w9(0) * s_up + w9(3) * yg + w9(6) * s_dn   # taps reading col c-1
        g_c = w9(1) * s_up + w9(4) * yg + w9(7) * s_dn   # taps reading col c
        g_r = w9(2) * s_up + w9(5) * yg + w9(8) * s_dn   # taps reading col c+1
        z = (g_c
             + m_lft * pltpu.roll(g_l, 1, 1)
             + m_rgt * pltpu.roll(g_r, hw - 1, 1)
             + b2)
        z = jnp.clip(z, 0.0, 6.0)                        # ReLU6 (G, HW)

        # ---- out = cat([y, z], channel axis) -------------------------------
        if cint % 8 == 0:
            o_ref[n, :cint, :] = y.astype(o_ref.dtype)   # sublane-aligned vst
            o_ref[n, cint:, :] = z.astype(o_ref.dtype)
        else:
            # Assemble in registers so the write is one full, unmasked slab
            # (avoids mid-(8,128)-tile masked sublane stores / false deps).
            o_ref[n] = jnp.concatenate([y, z], axis=0).astype(o_ref.dtype)


# ---------------------------------------------------------------------------
# Wrapper
# ---------------------------------------------------------------------------
def ghost_module_forward(x_nchw, params, s=2):
    """GhostModule forward (inference). x_nchw: (N, Cin, H, W) float32."""
    N, Cin, H, W = x_nchw.shape
    HW = H * W
    w1 = params["w_primary"][:, :, 0, 0]                    # (Cint, Cin)
    wd = params["w_cheap"][:, 0]                            # (G, 3, 3)
    Cint = w1.shape[0]
    G = wd.shape[0]
    Cout = Cint + G

    # Fold inference BatchNorm into the conv weights and a single bias.
    # TODO(synk): train-mode BatchNorm (batch statistics) is not implemented.
    eps = 1e-5
    sc1 = params["bn1_gamma"] * jax.lax.rsqrt(params["bn1_var"] + eps)
    b1 = params["bn1_beta"] - params["bn1_mean"] * sc1
    sc2 = params["bn2_gamma"] * jax.lax.rsqrt(params["bn2_var"] + eps)
    b2 = params["bn2_beta"] - params["bn2_mean"] * sc2

    # Tiny-Cin layers skip the MXU entirely; bigger layers use bf16 MXU weights.
    use_mxu = Cin > 8
    w1_f = (w1 * sc1[:, None]).astype(jnp.bfloat16 if use_mxu else jnp.float32)
    wd_f = (wd.reshape(G, 9) * sc2[:, None]).astype(jnp.float32)
    b1_f = b1.reshape(Cint, 1).astype(jnp.float32)
    b2_f = b2.reshape(G, 1).astype(jnp.float32)

    # Hoisted 0/1 border masks, built once on the host and kept resident:
    # rows = [r>=1, r<=H-2, c>=1, c<=W-2] over the flattened H*W axis.
    r_idx = jnp.arange(HW, dtype=jnp.int32) // W
    c_idx = jnp.arange(HW, dtype=jnp.int32) % W
    masks = jnp.stack([r_idx >= 1, r_idx <= H - 2,
                       c_idx >= 1, c_idx <= W - 2]).astype(jnp.float32)

    # Images per grid step: big enough to amortize the ~0.35-0.6 us per-step
    # cost for small layers, capped for unroll size and so the double-buffered
    # in+out blocks stay far below v7x's 64 MiB VMEM (v5e/v6e have 128 MiB).
    img_bytes = (Cin + Cout) * HW * x_nchw.dtype.itemsize
    nb = min(N, 8,
             max(1, (1 << 20) // img_bytes),
             max(1, (4 << 20) // img_bytes))
    while N % nb:            # keep every batch block full (no partial blocks)
        nb -= 1
    # TODO(synk): when N // nb < 2, split HW (or the y/z channel ranges) into a
    # second parallel grid axis so both v7x TensorCores stay busy.

    # NCHW -> (N, C, H*W): free reshape (no transpose pass over HBM).
    x_flat = x_nchw.reshape(N, Cin, HW)

    kernel = functools.partial(_ghost_fused_kernel, W=W, s=s, use_mxu=use_mxu)
    # TODO(synk): stream activations/outputs in bf16 end-to-end when embedded
    # in a bf16 network (halves HBM traffic on v6e/v7x).
    out = pl.pallas_call(
        kernel,
        out_shape=jax.ShapeDtypeStruct((N, Cout, HW), x_nchw.dtype),
        grid_spec=pltpu.PrefetchScalarGridSpec(
            num_scalar_prefetch=0,
            grid=(N // nb,),
            in_specs=[
                pl.BlockSpec((nb, Cin, HW), lambda i: (i, 0, 0)),
                pl.BlockSpec((Cint, Cin), lambda i: (0, 0)),
                pl.BlockSpec((Cint, 1), lambda i: (0, 0)),
                pl.BlockSpec((G, 9), lambda i: (0, 0)),
                pl.BlockSpec((G, 1), lambda i: (0, 0)),
                pl.BlockSpec((4, HW), lambda i: (0, 0)),
            ],
            out_specs=pl.BlockSpec((nb, Cout, HW), lambda i: (i, 0, 0)),
        ),
        compiler_params=pltpu.CompilerParams(
            dimension_semantics=("parallel",),
            # Blocks are capped at ~4 MiB each; 32 MiB covers 2x(in+out)
            # double-buffering + temporaries on every generation (v5e default
            # scoped VMEM is only 16 MiB, so the override matters there).
            vmem_limit_bytes=32 * 1024 * 1024,
        ),
    )(x_flat, w1_f, b1_f, wd_f, b2_f, masks)

    # (N, Cout, H*W) -> (N, Cout, H, W): free reshape; output is already the
    # channel-concatenated NCHW result (torch.cat([y, z], dim=1)).
    return out.reshape(N, Cout, H, W)


# ---------------------------------------------------------------------------
# Pure-JAX reference (XLA convs) for correctness checking
# ---------------------------------------------------------------------------
def ghost_module_reference(x, params, s=2, eps=1e-5):
    w1 = params["w_primary"]
    wd = params["w_cheap"]
    cint = w1.shape[0]
    dn = ("NCHW", "OIHW", "NCHW")
    y = jax.lax.conv_general_dilated(x, w1, (1, 1), "VALID",
                                     dimension_numbers=dn)
    sc1 = params["bn1_gamma"] * jax.lax.rsqrt(params["bn1_var"] + eps)
    y = (sc1[None, :, None, None] * (y - params["bn1_mean"][None, :, None, None])
         + params["bn1_beta"][None, :, None, None])
    y = jnp.maximum(y, 0.0)
    z = jax.lax.conv_general_dilated(y, wd, (1, 1), ((1, 1), (1, 1)),
                                     dimension_numbers=dn,
                                     feature_group_count=cint)
    sc2 = params["bn2_gamma"] * jax.lax.rsqrt(params["bn2_var"] + eps)
    z = (sc2[None, :, None, None] * (z - params["bn2_mean"][None, :, None, None])
         + params["bn2_beta"][None, :, None, None])
    z = jnp.clip(z, 0.0, 6.0)                  # ReLU6 (matches DW_Conv3x3BNReLU)
    return jnp.concatenate([y, z], axis=1)


def make_params(key, in_channels, out_channels, s=2):
    intrinsic = out_channels // s              # matches this module (no ceil/slice)
    ghost = intrinsic * (s - 1)
    k1, k2, k3, k4 = jax.random.split(key, 4)
    return {
        # primary 1x1 conv: (Cint, Cin, 1, 1), bias=False
        "w_primary": 0.2 * jax.random.normal(k1, (intrinsic, in_channels, 1, 1),
                                             jnp.float32),
        # depthwise 3x3 conv: (ghost, 1, 3, 3), groups=intrinsic, bias=False
        "w_cheap": 0.2 * jax.random.normal(k2, (ghost, 1, 3, 3), jnp.float32),
        # BatchNorm2d(intrinsic) running stats (inference mode)
        "bn1_gamma": 1.0 + 0.1 * jax.random.normal(k3, (intrinsic,), jnp.float32),
        "bn1_beta": 0.05 * jnp.arange(intrinsic, dtype=jnp.float32),
        "bn1_mean": 0.01 * jnp.arange(intrinsic, dtype=jnp.float32),
        "bn1_var": jnp.ones((intrinsic,), jnp.float32),
        # BatchNorm2d(ghost)
        "bn2_gamma": 1.0 + 0.1 * jax.random.normal(k4, (ghost,), jnp.float32),
        "bn2_beta": 0.05 * jnp.arange(ghost, dtype=jnp.float32),
        "bn2_mean": 0.01 * jnp.arange(ghost, dtype=jnp.float32),
        "bn2_var": jnp.ones((ghost,), jnp.float32),
    }


if __name__ == "__main__":
    key = jax.random.PRNGKey(0)
    kx, kp = jax.random.split(key)

    N, Cin, H, W = 2, 4, 16, 16
    out_channels, s = 8, 2

    x = jax.random.normal(kx, (N, Cin, H, W), jnp.float32)   # NCHW like PyTorch
    params = make_params(kp, Cin, out_channels, s)

    out = ghost_module_forward(x, params, s=s)
    jax.block_until_ready(out)
    assert out.shape == (N, out_channels, H, W), out.shape

    # Correctness check against a pure-JAX reference of the module.
    ref = ghost_module_reference(x, params, s=s)
    np.testing.assert_allclose(np.asarray(out), np.asarray(ref),
                               rtol=2e-2, atol=2e-2)

    print("KERNEL_OK")
</pallas_src>

<mosaic_0001>
module attributes {stable_mosaic.version = 11 : i64} {
  func.func @_ghost_fused_kernel(%arg0: i32, %arg1: memref<2x4x256xf32, #tpu.memory_space<vmem>>, %arg2: memref<4x4xf32, #tpu.memory_space<vmem>>, %arg3: memref<4x1xf32, #tpu.memory_space<vmem>>, %arg4: memref<4x9xf32, #tpu.memory_space<vmem>>, %arg5: memref<4x1xf32, #tpu.memory_space<vmem>>, %arg6: memref<4x256xf32, #tpu.memory_space<vmem>>, %arg7: memref<2x8x256xf32, #tpu.memory_space<vmem>>) attributes {dimension_semantics = [#tpu.dimension_semantics<parallel>], iteration_bounds = array<i64: 1>, scalar_prefetch = 0 : i64, scratch_operands = 0 : i64, tpu.core_type = #tpu.core_type<tc>, window_params = [{transform_indices = @transform_0, window_bounds = array<i64: 2, 4, 256>}, {pipeline_mode = #tpu.pipeline_mode<synchronous>, transform_indices = @transform_1, window_bounds = array<i64: 4, 4>}, {pipeline_mode = #tpu.pipeline_mode<synchronous>, transform_indices = @transform_2, window_bounds = array<i64: 4, 1>}, {pipeline_mode = #tpu.pipeline_mode<synchronous>, transform_indices = @transform_3, window_bounds = array<i64: 4, 9>}, {pipeline_mode = #tpu.pipeline_mode<synchronous>, transform_indices = @transform_4, window_bounds = array<i64: 4, 1>}, {pipeline_mode = #tpu.pipeline_mode<synchronous>, transform_indices = @transform_5, window_bounds = array<i64: 4, 256>}, {transform_indices = @transform_6, window_bounds = array<i64: 2, 8, 256>}]} {
    %c0 = arith.constant 0 : index
    %c0_0 = arith.constant 0 : index
    %0 = vector.load %arg2[%c0, %c0_0] : memref<4x4xf32, #tpu.memory_space<vmem>>, vector<4x4xf32>
    %c0_1 = arith.constant 0 : index
    %c0_2 = arith.constant 0 : index
    %1 = vector.load %arg3[%c0_1, %c0_2] : memref<4x1xf32, #tpu.memory_space<vmem>>, vector<4x1xf32>
    %c0_3 = arith.constant 0 : index
    %c0_4 = arith.constant 0 : index
    %2 = vector.load %arg4[%c0_3, %c0_4] : memref<4x9xf32, #tpu.memory_space<vmem>>, vector<4x9xf32>
    %c0_5 = arith.constant 0 : index
    %c0_6 = arith.constant 0 : index
    %3 = vector.load %arg5[%c0_5, %c0_6] : memref<4x1xf32, #tpu.memory_space<vmem>>, vector<4x1xf32>
    %c0_7 = arith.constant 0 : index
    %c0_8 = arith.constant 0 : index
    %4 = vector.load %arg6[%c0_7, %c0_8] : memref<4x256xf32, #tpu.memory_space<vmem>>, vector<4x256xf32>
    %5 = vector.extract_strided_slice %4 {offsets = [0, 0], sizes = [1, 256], strides = [1, 1]} : vector<4x256xf32> to vector<1x256xf32>
    %6 = vector.extract_strided_slice %4 {offsets = [1, 0], sizes = [1, 256], strides = [1, 1]} : vector<4x256xf32> to vector<1x256xf32>
    %7 = vector.extract_strided_slice %4 {offsets = [2, 0], sizes = [1, 256], strides = [1, 1]} : vector<4x256xf32> to vector<1x256xf32>
    %8 = vector.extract_strided_slice %4 {offsets = [3, 0], sizes = [1, 256], strides = [1, 1]} : vector<4x256xf32> to vector<1x256xf32>
    %c0_9 = arith.constant 0 : index
    %c0_10 = arith.constant 0 : index
    %c0_11 = arith.constant 0 : index
    %9 = vector.load %arg1[%c0_9, %c0_10, %c0_11] : memref<2x4x256xf32, #tpu.memory_space<vmem>>, vector<1x4x256xf32>
    %10 = vector.shape_cast %9 : vector<1x4x256xf32> to vector<4x256xf32>
    %11 = vector.extract_strided_slice %0 {offsets = [0, 0], sizes = [4, 1], strides = [1, 1]} : vector<4x4xf32> to vector<4x1xf32>
    %12 = vector.extract_strided_slice %10 {offsets = [0, 0], sizes = [1, 256], strides = [1, 1]} : vector<4x256xf32> to vector<1x256xf32>
    %13 = vector.broadcast %11 : vector<4x1xf32> to vector<4x256xf32>
    %14 = vector.broadcast %12 : vector<1x256xf32> to vector<4x256xf32>
    %15 = arith.mulf %13, %14 : vector<4x256xf32>
    %16 = vector.extract_strided_slice %0 {offsets = [0, 1], sizes = [4, 1], strides = [1, 1]} : vector<4x4xf32> to vector<4x1xf32>
    %17 = vector.extract_strided_slice %10 {offsets = [1, 0], sizes = [1, 256], strides = [1, 1]} : vector<4x256xf32> to vector<1x256xf32>
    %18 = vector.broadcast %16 : vector<4x1xf32> to vector<4x256xf32>
    %19 = vector.broadcast %17 : vector<1x256xf32> to vector<4x256xf32>
    %20 = arith.mulf %18, %19 : vector<4x256xf32>
    %21 = arith.addf %15, %20 : vector<4x256xf32>
    %22 = vector.extract_strided_slice %0 {offsets = [0, 2], sizes = [4, 1], strides = [1, 1]} : vector<4x4xf32> to vector<4x1xf32>
    %23 = vector.extract_strided_slice %10 {offsets = [2, 0], sizes = [1, 256], strides = [1, 1]} : vector<4x256xf32> to vector<1x256xf32>
    %24 = vector.broadcast %22 : vector<4x1xf32> to vector<4x256xf32>
    %25 = vector.broadcast %23 : vector<1x256xf32> to vector<4x256xf32>
    %26 = arith.mulf %24, %25 : vector<4x256xf32>
    %27 = arith.addf %21, %26 : vector<4x256xf32>
    %28 = vector.extract_strided_slice %0 {offsets = [0, 3], sizes = [4, 1], strides = [1, 1]} : vector<4x4xf32> to vector<4x1xf32>
    %29 = vector.extract_strided_slice %10 {offsets = [3, 0], sizes = [1, 256], strides = [1, 1]} : vector<4x256xf32> to vector<1x256xf32>
    %30 = vector.broadcast %28 : vector<4x1xf32> to vector<4x256xf32>
    %31 = vector.broadcast %29 : vector<1x256xf32> to vector<4x256xf32>
    %32 = arith.mulf %30, %31 : vector<4x256xf32>
    %33 = arith.addf %27, %32 : vector<4x256xf32>
    %34 = vector.broadcast %1 : vector<4x1xf32> to vector<4x256xf32>
    %35 = arith.addf %33, %34 : vector<4x256xf32>
    %cst = arith.constant 0.000000e+00 : f32
    %36 = vector.broadcast %cst : f32 to vector<4x256xf32>
    %37 = arith.maximumf %35, %36 : vector<4x256xf32>
    %c16_i32 = arith.constant 16 : i32
    %38 = tpu.dynamic_rotate %37 by %c16_i32 dim 1 : vector<4x256xf32>, i32 -> vector<4x256xf32>
    %39 = vector.broadcast %5 : vector<1x256xf32> to vector<4x256xf32>
    %40 = arith.mulf %39, %38 : vector<4x256xf32>
    %c240_i32 = arith.constant 240 : i32
    %41 = tpu.dynamic_rotate %37 by %c240_i32 dim 1 : vector<4x256xf32>, i32 -> vector<4x256xf32>
    %42 = vector.broadcast %6 : vector<1x256xf32> to vector<4x256xf32>
    %43 = arith.mulf %42, %41 : vector<4x256xf32>
    %44 = vector.extract_strided_slice %2 {offsets = [0, 0], sizes = [4, 1], strides = [1, 1]} : vector<4x9xf32> to vector<4x1xf32>
    %45 = vector.broadcast %44 : vector<4x1xf32> to vector<4x256xf32>
    %46 = arith.mulf %45, %40 : vector<4x256xf32>
    %47 = vector.extract_strided_slice %2 {offsets = [0, 3], sizes = [4, 1], strides = [1, 1]} : vector<4x9xf32> to vector<4x1xf32>
    %48 = vector.broadcast %47 : vector<4x1xf32> to vector<4x256xf32>
    %49 = arith.mulf %48, %37 : vector<4x256xf32>
    %50 = arith.addf %46, %49 : vector<4x256xf32>
    %51 = vector.extract_strided_slice %2 {offsets = [0, 6], sizes = [4, 1], strides = [1, 1]} : vector<4x9xf32> to vector<4x1xf32>
    %52 = vector.broadcast %51 : vector<4x1xf32> to vector<4x256xf32>
    %53 = arith.mulf %52, %43 : vector<4x256xf32>
    %54 = arith.addf %50, %53 : vector<4x256xf32>
    %55 = vector.extract_strided_slice %2 {offsets = [0, 1], sizes = [4, 1], strides = [1, 1]} : vector<4x9xf32> to vector<4x1xf32>
    %56 = vector.broadcast %55 : vector<4x1xf32> to vector<4x256xf32>
    %57 = arith.mulf %56, %40 : vector<4x256xf32>
    %58 = vector.extract_strided_slice %2 {offsets = [0, 4], sizes = [4, 1], strides = [1, 1]} : vector<4x9xf32> to vector<4x1xf32>
    %59 = vector.broadcast %58 : vector<4x1xf32> to vector<4x256xf32>
    %60 = arith.mulf %59, %37 : vector<4x256xf32>
    %61 = arith.addf %57, %60 : vector<4x256xf32>
    %62 = vector.extract_strided_slice %2 {offsets = [0, 7], sizes = [4, 1], strides = [1, 1]} : vector<4x9xf32> to vector<4x1xf32>
    %63 = vector.broadcast %62 : vector<4x1xf32> to vector<4x256xf32>
    %64 = arith.mulf %63, %43 : vector<4x256xf32>
    %65 = arith.addf %61, %64 : vector<4x256xf32>
    %66 = vector.extract_strided_slice %2 {offsets = [0, 2], sizes = [4, 1], strides = [1, 1]} : vector<4x9xf32> to vector<4x1xf32>
    %67 = vector.broadcast %66 : vector<4x1xf32> to vector<4x256xf32>
    %68 = arith.mulf %67, %40 : vector<4x256xf32>
    %69 = vector.extract_strided_slice %2 {offsets = [0, 5], sizes = [4, 1], strides = [1, 1]} : vector<4x9xf32> to vector<4x1xf32>
    %70 = vector.broadcast %69 : vector<4x1xf32> to vector<4x256xf32>
    %71 = arith.mulf %70, %37 : vector<4x256xf32>
    %72 = arith.addf %68, %71 : vector<4x256xf32>
    %73 = vector.extract_strided_slice %2 {offsets = [0, 8], sizes = [4, 1], strides = [1, 1]} : vector<4x9xf32> to vector<4x1xf32>
    %74 = vector.broadcast %73 : vector<4x1xf32> to vector<4x256xf32>
    %75 = arith.mulf %74, %43 : vector<4x256xf32>
    %76 = arith.addf %72, %75 : vector<4x256xf32>
    %c1_i32 = arith.constant 1 : i32
    %77 = tpu.dynamic_rotate %54 by %c1_i32 dim 1 : vector<4x256xf32>, i32 -> vector<4x256xf32>
    %78 = vector.broadcast %7 : vector<1x256xf32> to vector<4x256xf32>
    %79 = arith.mulf %78, %77 : vector<4x256xf32>
    %80 = arith.addf %65, %79 : vector<4x256xf32>
    %c255_i32 = arith.constant 255 : i32
    %81 = tpu.dynamic_rotate %76 by %c255_i32 dim 1 : vector<4x256xf32>, i32 -> vector<4x256xf32>
    %82 = vector.broadcast %8 : vector<1x256xf32> to vector<4x256xf32>
    %83 = arith.mulf %82, %81 : vector<4x256xf32>
    %84 = arith.addf %80, %83 : vector<4x256xf32>
    %85 = vector.broadcast %3 : vector<4x1xf32> to vector<4x256xf32>
    %86 = arith.addf %84, %85 : vector<4x256xf32>
    %cst_12 = arith.constant 0.000000e+00 : f32
    %cst_13 = arith.constant 6.000000e+00 : f32
    %87 = vector.broadcast %cst_12 : f32 to vector<4x256xf32>
    %88 = arith.maximumf %87, %86 : vector<4x256xf32>
    %89 = vector.broadcast %cst_13 : f32 to vector<4x256xf32>
    %90 = arith.minimumf %89, %88 : vector<4x256xf32>
    %91 = tpu.concatenate %37, %90 in 0 : vector<4x256xf32>, vector<4x256xf32> -> vector<8x256xf32>
    %c0_14 = arith.constant 0 : index
    %c0_15 = arith.constant 0 : index
    %c0_16 = arith.constant 0 : index
    %92 = vector.load %arg7[%c0_14, %c0_15, %c0_16] : memref<2x8x256xf32, #tpu.memory_space<vmem>>, vector<1x8x256xf32>
    %93 = vector.shape_cast %92 : vector<1x8x256xf32> to vector<8x256xf32>
    %94 = vector.shape_cast %91 : vector<8x256xf32> to vector<1x8x256xf32>
    tpu.vector_store %arg7[%c0_14, %c0_15, %c0_16], %94 {strides = array<i32>} : memref<2x8x256xf32, #tpu.memory_space<vmem>>, vector<1x8x256xf32>,
    %c1 = arith.constant 1 : index
    %c0_17 = arith.constant 0 : index
    %c0_18 = arith.constant 0 : index
    %95 = vector.load %arg1[%c1, %c0_17, %c0_18] : memref<2x4x256xf32, #tpu.memory_space<vmem>>, vector<1x4x256xf32>
    %96 = vector.shape_cast %95 : vector<1x4x256xf32> to vector<4x256xf32>
    %97 = vector.extract_strided_slice %0 {offsets = [0, 0], sizes = [4, 1], strides = [1, 1]} : vector<4x4xf32> to vector<4x1xf32>
    %98 = vector.extract_strided_slice %96 {offsets = [0, 0], sizes = [1, 256], strides = [1, 1]} : vector<4x256xf32> to vector<1x256xf32>
    %99 = vector.broadcast %97 : vector<4x1xf32> to vector<4x256xf32>
    %100 = vector.broadcast %98 : vector<1x256xf32> to vector<4x256xf32>
    %101 = arith.mulf %99, %100 : vector<4x256xf32>
    %102 = vector.extract_strided_slice %0 {offsets = [0, 1], sizes = [4, 1], strides = [1, 1]} : vector<4x4xf32> to vector<4x1xf32>
    %103 = vector.extract_strided_slice %96 {offsets = [1, 0], sizes = [1, 256], strides = [1, 1]} : vector<4x256xf32> to vector<1x256xf32>
    %104 = vector.broadcast %102 : vector<4x1xf32> to vector<4x256xf32>
    %105 = vector.broadcast %103 : vector<1x256xf32> to vector<4x256xf32>
    %106 = arith.mulf %104, %105 : vector<4x256xf32>
    %107 = arith.addf %101, %106 : vector<4x256xf32>
    %108 = vector.extract_strided_slice %0 {offsets = [0, 2], sizes = [4, 1], strides = [1, 1]} : vector<4x4xf32> to vector<4x1xf32>
    %109 = vector.extract_strided_slice %96 {offsets = [2, 0], sizes = [1, 256], strides = [1, 1]} : vector<4x256xf32> to vector<1x256xf32>
    %110 = vector.broadcast %108 : vector<4x1xf32> to vector<4x256xf32>
    %111 = vector.broadcast %109 : vector<1x256xf32> to vector<4x256xf32>
    %112 = arith.mulf %110, %111 : vector<4x256xf32>
    %113 = arith.addf %107, %112 : vector<4x256xf32>
    %114 = vector.extract_strided_slice %0 {offsets = [0, 3], sizes = [4, 1], strides = [1, 1]} : vector<4x4xf32> to vector<4x1xf32>
    %115 = vector.extract_strided_slice %96 {offsets = [3, 0], sizes = [1, 256], strides = [1, 1]} : vector<4x256xf32> to vector<1x256xf32>
    %116 = vector.broadcast %114 : vector<4x1xf32> to vector<4x256xf32>
    %117 = vector.broadcast %115 : vector<1x256xf32> to vector<4x256xf32>
    %118 = arith.mulf %116, %117 : vector<4x256xf32>
    %119 = arith.addf %113, %118 : vector<4x256xf32>
    %120 = vector.broadcast %1 : vector<4x1xf32> to vector<4x256xf32>
    %121 = arith.addf %119, %120 : vector<4x256xf32>
    %cst_19 = arith.constant 0.000000e+00 : f32
    %122 = vector.broadcast %cst_19 : f32 to vector<4x256xf32>
    %123 = arith.maximumf %121, %122 : vector<4x256xf32>
    %c16_i32_20 = arith.constant 16 : i32
    %124 = tpu.dynamic_rotate %123 by %c16_i32_20 dim 1 : vector<4x256xf32>, i32 -> vector<4x256xf32>
    %125 = vector.broadcast %5 : vector<1x256xf32> to vector<4x256xf32>
    %126 = arith.mulf %125, %124 : vector<4x256xf32>
    %c240_i32_21 = arith.constant 240 : i32
    %127 = tpu.dynamic_rotate %123 by %c240_i32_21 dim 1 : vector<4x256xf32>, i32 -> vector<4x256xf32>
    %128 = vector.broadcast %6 : vector<1x256xf32> to vector<4x256xf32>
    %129 = arith.mulf %128, %127 : vector<4x256xf32>
    %130 = vector.extract_strided_slice %2 {offsets = [0, 0], sizes = [4, 1], strides = [1, 1]} : vector<4x9xf32> to vector<4x1xf32>
    %131 = vector.broadcast %130 : vector<4x1xf32> to vector<4x256xf32>
    %132 = arith.mulf %131, %126 : vector<4x256xf32>
    %133 = vector.extract_strided_slice %2 {offsets = [0, 3], sizes = [4, 1], strides = [1, 1]} : vector<4x9xf32> to vector<4x1xf32>
    %134 = vector.broadcast %133 : vector<4x1xf32> to vector<4x256xf32>
    %135 = arith.mulf %134, %123 : vector<4x256xf32>
    %136 = arith.addf %132, %135 : vector<4x256xf32>
    %137 = vector.extract_strided_slice %2 {offsets = [0, 6], sizes = [4, 1], strides = [1, 1]} : vector<4x9xf32> to vector<4x1xf32>
    %138 = vector.broadcast %137 : vector<4x1xf32> to vector<4x256xf32>
    %139 = arith.mulf %138, %129 : vector<4x256xf32>
    %140 = arith.addf %136, %139 : vector<4x256xf32>
    %141 = vector.extract_strided_slice %2 {offsets = [0, 1], sizes = [4, 1], strides = [1, 1]} : vector<4x9xf32> to vector<4x1xf32>
    %142 = vector.broadcast %141 : vector<4x1xf32> to vector<4x256xf32>
    %143 = arith.mulf %142, %126 : vector<4x256xf32>
    %144 = vector.extract_strided_slice %2 {offsets = [0, 4], sizes = [4, 1], strides = [1, 1]} : vector<4x9xf32> to vector<4x1xf32>
    %145 = vector.broadcast %144 : vector<4x1xf32> to vector<4x256xf32>
    %146 = arith.mulf %145, %123 : vector<4x256xf32>
    %147 = arith.addf %143, %146 : vector<4x256xf32>
    %148 = vector.extract_strided_slice %2 {offsets = [0, 7], sizes = [4, 1], strides = [1, 1]} : vector<4x9xf32> to vector<4x1xf32>
    %149 = vector.broadcast %148 : vector<4x1xf32> to vector<4x256xf32>
    %150 = arith.mulf %149, %129 : vector<4x256xf32>
    %151 = arith.addf %147, %150 : vector<4x256xf32>
    %152 = vector.extract_strided_slice %2 {offsets = [0, 2], sizes = [4, 1], strides = [1, 1]} : vector<4x9xf32> to vector<4x1xf32>
    %153 = vector.broadcast %152 : vector<4x1xf32> to vector<4x256xf32>
    %154 = arith.mulf %153, %126 : vector<4x256xf32>
    %155 = vector.extract_strided_slice %2 {offsets = [0, 5], sizes = [4, 1], strides = [1, 1]} : vector<4x9xf32> to vector<4x1xf32>
    %156 = vector.broadcast %155 : vector<4x1xf32> to vector<4x256xf32>
    %157 = arith.mulf %156, %123 : vector<4x256xf32>
    %158 = arith.addf %154, %157 : vector<4x256xf32>
    %159 = vector.extract_strided_slice %2 {offsets = [0, 8], sizes = [4, 1], strides = [1, 1]} : vector<4x9xf32> to vector<4x1xf32>
    %160 = vector.broadcast %159 : vector<4x1xf32> to vector<4x256xf32>
    %161 = arith.mulf %160, %129 : vector<4x256xf32>
    %162 = arith.addf %158, %161 : vector<4x256xf32>
    %c1_i32_22 = arith.constant 1 : i32
    %163 = tpu.dynamic_rotate %140 by %c1_i32_22 dim 1 : vector<4x256xf32>, i32 -> vector<4x256xf32>
    %164 = vector.broadcast %7 : vector<1x256xf32> to vector<4x256xf32>
    %165 = arith.mulf %164, %163 : vector<4x256xf32>
    %166 = arith.addf %151, %165 : vector<4x256xf32>
    %c255_i32_23 = arith.constant 255 : i32
    %167 = tpu.dynamic_rotate %162 by %c255_i32_23 dim 1 : vector<4x256xf32>, i32 -> vector<4x256xf32>
    %168 = vector.broadcast %8 : vector<1x256xf32> to vector<4x256xf32>
    %169 = arith.mulf %168, %167 : vector<4x256xf32>
    %170 = arith.addf %166, %169 : vector<4x256xf32>
    %171 = vector.broadcast %3 : vector<4x1xf32> to vector<4x256xf32>
    %172 = arith.addf %170, %171 : vector<4x256xf32>
    %cst_24 = arith.constant 0.000000e+00 : f32
    %cst_25 = arith.constant 6.000000e+00 : f32
    %173 = vector.broadcast %cst_24 : f32 to vector<4x256xf32>
    %174 = arith.maximumf %173, %172 : vector<4x256xf32>
    %175 = vector.broadcast %cst_25 : f32 to vector<4x256xf32>
    %176 = arith.minimumf %175, %174 : vector<4x256xf32>
    %177 = tpu.concatenate %123, %176 in 0 : vector<4x256xf32>, vector<4x256xf32> -> vector<8x256xf32>
    %c1_26 = arith.constant 1 : index
    %c0_27 = arith.constant 0 : index
    %c0_28 = arith.constant 0 : index
    %178 = vector.load %arg7[%c1_26, %c0_27, %c0_28] : memref<2x8x256xf32, #tpu.memory_space<vmem>>, vector<1x8x256xf32>
    %179 = vector.shape_cast %178 : vector<1x8x256xf32> to vector<8x256xf32>
    %180 = vector.shape_cast %177 : vector<8x256xf32> to vector<1x8x256xf32>
    tpu.vector_store %arg7[%c1_26, %c0_27, %c0_28], %180 {strides = array<i32>} : memref<2x8x256xf32, #tpu.memory_space<vmem>>, vector<1x8x256xf32>,
    return
  }
  func.func @transform_0(%arg0: i32) -> (i32, i32, i32) {
    %c0_i32 = arith.constant 0 : i32
    %c0_i32_0 = arith.constant 0 : i32
    %c0_i32_1 = arith.constant 0 : i32
    return %arg0, %c0_i32, %c0_i32_0 : i32, i32, i32
  }
  func.func @transform_1(%arg0: i32) -> (i32, i32) {
    %c0_i32 = arith.constant 0 : i32
    %c0_i32_0 = arith.constant 0 : i32
    %c0_i32_1 = arith.constant 0 : i32
    return %c0_i32, %c0_i32_0 : i32, i32
  }
  func.func @transform_2(%arg0: i32) -> (i32, i32) {
    %c0_i32 = arith.constant 0 : i32
    %c0_i32_0 = arith.constant 0 : i32
    %c0_i32_1 = arith.constant 0 : i32
    return %c0_i32, %c0_i32_0 : i32, i32
  }
  func.func @transform_3(%arg0: i32) -> (i32, i32) {
    %c0_i32 = arith.constant 0 : i32
    %c0_i32_0 = arith.constant 0 : i32
    %c0_i32_1 = arith.constant 0 : i32
    return %c0_i32, %c0_i32_0 : i32, i32
  }
  func.func @transform_4(%arg0: i32) -> (i32, i32) {
    %c0_i32 = arith.constant 0 : i32
    %c0_i32_0 = arith.constant 0 : i32
    %c0_i32_1 = arith.constant 0 : i32
    return %c0_i32, %c0_i32_0 : i32, i32
  }
  func.func @transform_5(%arg0: i32) -> (i32, i32) {
    %c0_i32 = arith.constant 0 : i32
    %c0_i32_0 = arith.constant 0 : i32
    %c0_i32_1 = arith.constant 0 : i32
    return %c0_i32, %c0_i32_0 : i32, i32
  }
  func.func @transform_6(%arg0: i32) -> (i32, i32, i32) {
    %c0_i32 = arith.constant 0 : i32
    %c0_i32_0 = arith.constant 0 : i32
    %c0_i32_1 = arith.constant 0 : i32
    return %arg0, %c0_i32, %c0_i32_0 : i32, i32, i32
  }
}

</mosaic_0001>

<bundles_post_ra>
// kernel: tpu_custom_call.1
= control target key start
LH: loop header
LB: loop body
LE: loop exit
PB: predicated region body
PF: predicated region fallthrough
CT: control target
= control target key end

     0   :  { %11 = vsyncpa [#allocation3], 0  ;;  %s952_s0 = inlined_call_operand.hbm [shape: f32[2,4,256], index: 0, kind: input, shape index: {}]   ;;  %s953_s1 = inlined_call_operand.vmem [shape: f32[4,4], index: 1, kind: input, shape index: {}]   ;;  %s954_s2 = inlined_call_operand.vmem [shape: f32[4,1], index: 2, kind: input, shape index: {}]   ;;  %s955_s3 = inlined_call_operand.vmem [shape: f32[4,9], index: 3, kind: input, shape index: {}]   ;;  %s956_s4 = inlined_call_operand.vmem [shape: f32[4,1], index: 4, kind: input, shape index: {}]   ;;  %s957_s5 = inlined_call_operand.vmem [shape: f32[4,256], index: 5, kind: input, shape index: {}]   ;;  %s958_s6 = inlined_call_operand.hbm [shape: f32[2,8,256], index: 6, kind: output, shape index: {}]  }
   0x1   :  { %12 = vsyncpa [#allocation4], 0  ;;  %s635_s21 = smov [#allocation2]   ;;  %s587_s25 = scalar_lea.hbm %s952_s0, 256 }
   0x2   :  { %s18_s22 = sshll.u32 %s635_s21, 4  ;;  %p588_p0 = scmp.ne.s32.totalorder %s952_s0, %s587_s25  ;;  %s19_s22 = int_to_ptr.vmem [resolvable:$true] %s18_s22 }
   0x3   :  { %p591_p1 = scmp.lt.u32.totalorder %s587_s25, %s952_s0 }
   0x5   :  { %p593_p2 = pnand %p591_p1, %p588_p0 }
   0x7   :  { %596 = shalt.err (!%p593_p2)
}
   0x8   :  { %s597_s30 = scalar_lea.vmem %s19_s22, 256  ;;  %p602_p4 = scmp.lt.s32.totalorder %s19_s22, %s19_s22 }
   0x9   :  { %p598_p3 = scmp.ne.s32.totalorder %s19_s22, %s597_s30  ;;  %p603_p5 = scmp.lt.s32.totalorder %s597_s30, %s597_s30 }
   0xb   :  { %p604_p6 = por %p603_p5, %p602_p4 }
   0xd   :  { %p605_p7 = pnand %p604_p6, %p598_p3 }
   0xf   :  { %608 = shalt.err (!%p605_p7)
}
  0x10   :  { %s636_s7 = smov 128   ;;  %s637_s8 = smov 8  }
  0x11   :  { %24 = dma.hbm_to_vmem [thread:$0]  %s952_s0, 256, %s19_s22, [#allocation3], %s636_s7, %s636_s7, %s637_s8  }
  0x12   :  { %631 = dma.done.wait [#allocation3], 256  }
  0x13   :  { %632 = vsyncadd [#allocation3], 4294967040  ;;  %v638_v0 = vmov 2   ;;  %v639_v1 = vmov 0   ;;  %v38_v2 = vld [vmem:[%s953_s1] sm:$0xf]  ;;  %v50_v11 = vlaneseq }
  0x14   :  { %574 = vset.pattern.permute.xlu1 %v638_v0  ;;  %572 = vset.pattern.permute.xlu0 %v639_v1  ;;  %v640_v3 = vmov 3   ;;  %v641_v4 = vmov 1   ;;  %v39_v5 = vld [vmem:[%s954_s2] sm:$0xf]  ;;  %v642_v7 = vmov 6   ;;  %v643_v8 = vmov 5  }
  0x15   :  { %97 = vperm.xlu1 %574, %v38_v2   ;;  %46 = vperm.xlu0 %572, %v38_v2   ;;  %v711_v6 = vld [vmem:[%s955_s3] sm:$0xf]  ;;  %v644_v9 = vmov 8   ;;  %v645_v10 = vmov 4   ;;  %v51_v12 = vshrl.u32 %v50_v11, 7  ;;  %v362_v16 = vld [vmem:[#allocation2 + $0x8] sm:$0xff] }
  0x16   :  { %v43_v15 = vld [vmem:[#allocation2] sm:$0xff]  ;;  %s646_s1 = smov 16   ;;  %s647_s2 = smov 112   ;;  %vm356_vm4 = vcmask 1043456  }
  0x17   :  { %v721_v13 = vsub.s32 0, %v51_v12  ;;  %v723_v14 = vsub.s32 4, %v51_v12  ;;  %v725_v17 = vsub.s32 2, %v51_v12  ;;  %v727_v18 = vsub.s32 6, %v51_v12  ;;  %s651_s19 = smov [#allocation5]  }
  0x18   :  { %v729_v19 = vsub.s32 1, %v51_v12  ;;  %v731_v20 = vsub.s32 5, %v51_v12  ;;  %v733_v21 = vsub.s32 3, %v51_v12  ;;  %v735_v22 = vsub.s32 7, %v51_v12  ;;  %s542_s20 = sshll.u32 %s651_s19, 4  ;;  %s543_s20 = int_to_ptr.vmem [resolvable:$true] %s542_s20 }
  0x19   :  { %575 = vset.pattern.permute.xlu1 %v640_v3  ;;  %573 = vset.pattern.permute.xlu0 %v641_v4  ;;  %v53_v23 = vrot.slane %v43_v15, %v721_v13  ;;  %v57_v24 = vrot.slane %v43_v15, %v723_v14  ;;  %v367_v25 = vrot.slane %v362_v16, %v721_v13  ;;  %s609_s21 = scalar_lea.vmem %s543_s20, 512  ;;  %p614_p9 = scmp.lt.s32.totalorder %s543_s20, %s543_s20 }
  0x1a   :  { %123 = vperm.xlu1 %575, %v38_v2   ;;  %71 = vperm.xlu0 %573, %v38_v2   ;;  %v371_v26 = vrot.slane %v362_v16, %v723_v14  ;;  %v103_v27 = vrot.slane %v43_v15, %v725_v17  ;;  %v107_v28 = vrot.slane %v43_v15, %v727_v18  ;;  %p610_p8 = scmp.ne.s32.totalorder %s543_s20, %s609_s21  ;;  %p615_p10 = scmp.lt.s32.totalorder %s609_s21, %s609_s21 }
  0x1b   :  { %v409_v29 = vrot.slane %v362_v16, %v725_v17  ;;  %v77_v30 = vrot.slane %v43_v15, %v729_v19  ;;  %v81_v31 = vrot.slane %v43_v15, %v731_v20  ;;  %v387_v32 = vrot.slane %v362_v16, %v729_v19 }
  0x1c   :  { %v391_v33 = vrot.slane %v362_v16, %v731_v20  ;;  %v413_v34 = vrot.slane %v362_v16, %v727_v18  ;;  %v129_v35 = vrot.slane %v43_v15, %v733_v21  ;;  %v133_v36 = vrot.slane %v43_v15, %v735_v22  ;;  %p616_p11 = por %p615_p10, %p614_p9 }
  0x1d   :  { %v431_v37 = vrot.slane %v362_v16, %v733_v21  ;;  %v63_v38 = vrot.slane %v53_v23, %v721_v13  ;;  %v67_v39 = vrot.slane %v57_v24, %v721_v13  ;;  %v377_v40 = vrot.slane %v367_v25, %v721_v13 }
  0x1e   :  { %576 = vset.pattern.permute.xlu1 %v639_v1  ;;  %577 = vset.pattern.permute.xlu0 %v639_v1  ;;  %v435_v43 = vrot.slane %v362_v16, %v735_v22  ;;  %v381_v44 = vrot.slane %v371_v26, %v721_v13  ;;  %v113_v45 = vrot.slane %v103_v27, %v725_v17  ;;  %p617_p12 = pnand %p616_p11, %p610_p8 }
  0x1f   :  { %150 = vperm.xlu1 %576, %v39_v5   ;;  %216 = vperm.xlu0 %577, %v711_v6   ;;  %v117_v46 = vrot.slane %v107_v28, %v725_v17  ;;  %v419_v47 = vrot.slane %v409_v29, %v725_v17  ;;  %v87_v48 = vrot.slane %v77_v30, %v729_v19 }
  0x20   :  { %v91_v49 = vrot.slane %v81_v31, %v729_v19  ;;  %v397_v50 = vrot.slane %v387_v32, %v729_v19  ;;  %v401_v51 = vrot.slane %v391_v33, %v729_v19  ;;  %v423_v52 = vrot.slane %v413_v34, %v725_v17 }
  0x21   :  { %v139_v53 = vrot.slane %v129_v35, %v733_v21  ;;  %v143_v54 = vrot.slane %v133_v36, %v733_v21  ;;  %v441_v55 = vrot.slane %v431_v37, %v733_v21  ;;  %v445_v59 = vrot.slane %v435_v43, %v733_v21  ;;  %v41_v43 = vld [vmem:[%s956_s4] sm:$0xf]  ;;  %s649_s4 = smov 1  }
  0x23   :  { %578 = vset.pattern.permute.xlu1 %v640_v3  ;;  %580 = vset.pattern.permute.xlu0 %v638_v0 }
  0x24   :  { %222 = vperm.xlu1 %578, %v711_v6   ;;  %260 = vperm.xlu0 %580, %v711_v6  }
  0x28   :  { %579 = vset.pattern.permute.xlu1 %v642_v7  ;;  %583 = vset.pattern.permute.xlu0 %v641_v4 }
  0x29   :  { %230 = vperm.xlu1 %579, %v711_v6  }
  0x2d   :  { %581 = vset.pattern.permute.xlu1 %v643_v8 }
  0x2e   :  { %266 = vperm.xlu1 %581, %v711_v6  }
  0x32   :  { %582 = vset.pattern.permute.xlu1 %v644_v9 }
  0x33   :  { %274 = vperm.xlu1 %582, %v711_v6  }
  0x37   :  { %584 = vset.pattern.permute.xlu1 %v645_v10 }
  0x94   :  { %v47_v41 = vpop.permute.xlu0 %46  ;;  %v98_v42 = vpop.permute.xlu1 %97 }
  0x95   :  { %v68_v56 = vmul.f32 %v63_v38, %v47_v41  ;;  %v69_v57 = vmul.f32 %v67_v39, %v47_v41  ;;  %v382_v58 = vmul.f32 %v377_v40, %v47_v41  ;;  %v383_v60 = vmul.f32 %v381_v44, %v47_v41 }
  0x96   :  { %v118_v61 = vmul.f32 %v113_v45, %v98_v42  ;;  %v119_v62 = vmul.f32 %v117_v46, %v98_v42  ;;  %v424_v63 = vmul.f32 %v419_v47, %v98_v42  ;;  %v425_v8 = vmul.f32 %v423_v52, %v98_v42 }
  0x97   :  { %v648_v44 = vmov 7  }
  0x99   :  { %v72_v0 = vpop.permute.xlu0 %71  ;;  %v124_v2 = vpop.permute.xlu1 %123 }
  0x9a   :  { %v92_v3 = vmul.f32 %v87_v48, %v72_v0  ;;  %v93_v4 = vmul.f32 %v91_v49, %v72_v0  ;;  %v402_v5 = vmul.f32 %v397_v50, %v72_v0  ;;  %v403_v7 = vmul.f32 %v401_v51, %v72_v0  ;;  %v805_v49 = vld [vmem:[%s957_s5] sm:$0xff]  ;;  %s650_s5 = smov 127  }
  0x9b   :  { %v144_v9 = vmul.f32 %v139_v53, %v124_v2  ;;  %v145_v10 = vmul.f32 %v143_v54, %v124_v2  ;;  %v446_v12 = vmul.f32 %v441_v55, %v124_v2  ;;  %v447_v25 = vmul.f32 %v445_v59, %v124_v2 }
  0x9c   :  { %v94_v15 = vadd.f32 %v92_v3, %v68_v56  ;;  %v95_v16 = vadd.f32 %v93_v4, %v69_v57  ;;  %v404_v23 = vadd.f32 %v402_v5, %v382_v58  ;;  %v405_v24 = vadd.f32 %v403_v7, %v383_v60 }
  0x9d   :  { %v812_v51 = vand.u32 127, %v50_v11  ;;  %v170_v52 = vrot.slane %v805_v49, %v721_v13  ;;  %v201_v58 = vrot.slane %v805_v49, %v731_v20 }
  0x9e   :  { %v120_v26 = vadd.f32 %v118_v61, %v94_v15  ;;  %v121_v27 = vadd.f32 %v119_v62, %v95_v16  ;;  %v426_v28 = vadd.f32 %v424_v63, %v404_v23  ;;  %v427_v29 = vadd.f32 %v425_v8, %v405_v24  ;;  %v151_v30 = vpop.permute.xlu1 %150  ;;  %v217_v47 = vpop.permute.xlu0 %216 }
  0x9f   :  { %vm163_vm0 = vcmp.lt.s32.totalorder %v812_v51, 16  ;;  %v180_v56 = vrot.slane %v170_v52, %v721_v13  ;;  %vm191_vm1 = vcmp.lt.s32.totalorder %v812_v51, 112  ;;  %v211_v0 = vrot.slane %v201_v58, %v729_v19 }
  0xa0   :  { %v146_v31 = vadd.f32 %v144_v9, %v120_v26  ;;  %v147_v32 = vadd.f32 %v145_v10, %v121_v27  ;;  %v448_v33 = vadd.f32 %v446_v12, %v426_v28  ;;  %v449_v34 = vadd.f32 %v447_v25, %v427_v29 }
  0xa1   :  { %vm285_vm2 = vcmp.lt.s32.totalorder %v812_v51, 1  ;;  %vm314_vm3 = vcmp.lt.s32.totalorder %v812_v51, 127 }
  0xa2   :  { %v153_v35 = vadd.f32 %v151_v30, %v146_v31  ;;  %v154_v36 = vadd.f32 %v151_v30, %v147_v32  ;;  %v450_v39 = vadd.f32 %v448_v33, %v151_v30  ;;  %v451_v40 = vadd.f32 %v449_v34, %v151_v30 }
  0xa3   :  { %v796_v45 = vpop.permute.xlu1 %222  ;;  %v807_v50 = vpop.permute.xlu0 %260 }
  0xa4   :  { %v769_v37 = vmax.f32 %v153_v35, 0.0  ;;  %v771_v38 = vmax.f32 %v154_v36, 0.0  ;;  %v777_v41 = vmax.f32 %v450_v39, 0.0  ;;  %v779_v42 = vmax.f32 %v451_v40, 0.0 }
  0xa6   :  { %159 = vrot.lane.b32.xlu0 %v771_v38, %s646_s1  ;;  %157 = vrot.lane.b32.xlu1 %v769_v37, %s646_s1  ;;  %v226_v8 = vmul.f32 %v796_v45, %v771_v38  ;;  %v225_v10 = vmul.f32 %v796_v45, %v769_v37  ;;  %v472_v16 = vmul.f32 %v777_v41, %v796_v45 }
  0xa8   :  { %v798_v46 = vpop.permute.xlu1 %230 }
  0xaa   :  { %454 = vrot.lane.b32.xlu0 %v777_v41, %s646_s1  ;;  %456 = vrot.lane.b32.xlu1 %v779_v42, %s646_s1 }
  0xad   :  { %v800_v48 = vpop.permute.xlu1 %266 }
  0xae   :  { %187 = vrot.lane.b32.xlu0 %v769_v37, %s647_s2  ;;  %189 = vrot.lane.b32.xlu1 %v771_v38, %s647_s2  ;;  %v269_v32 = vmul.f32 %v800_v48, %v769_v37 }
  0xb2   :  { %462 = vrot.lane.b32.xlu0 %v777_v41, %s647_s2  ;;  %464 = vrot.lane.b32.xlu1 %v779_v42, %s647_s2 }
  0xb6   :  { %238 = vperm.xlu0 %583, %v711_v6   ;;  %244 = vperm.xlu1 %584, %v711_v6  }
  0xba   :  { %586 = vset.pattern.permute.xlu0 %v639_v1  ;;  %585 = vset.pattern.permute.xlu1 %v648_v44  ;;  %v809_v1 = vpop.permute.xlu1 %274 }
  0xbb   :  { %341 = vperm.xlu0 %586, %v41_v43   ;;  %252 = vperm.xlu1 %585, %v711_v6   ;;  %v174_v6 = vrot.slane %v805_v49, %v723_v14  ;;  %v197_v14 = vrot.slane %v805_v49, %v729_v19 }
  0xbd   :  { %v184_v53 = vrot.slane %v174_v6, %v721_v13  ;;  %v207_v63 = vrot.slane %v197_v14, %v729_v19 }
 0x118   :  { %v160_v54 = vpop.permute.xlu0 %159  ;;  %v158_v55 = vpop.permute.xlu1 %157 }
 0x119   :  { %v164_v57 = vsel %vm163_vm0, %v158_v55, %v160_v54  ;;  %v165_v11 = vsel %vm163_vm0, %v160_v54, %v158_v55  ;;  %v473_v55 = vmul.f32 %v779_v42, %v796_v45  ;;  %v270_v45 = vmul.f32 %v800_v48, %v771_v38 }
 0x11a   :  { %v829_v59 = vmul.f32 %v184_v53, %v164_v57  ;;  %v831_v61 = vmul.f32 %v180_v56, %v165_v11 }
 0x11c   :  { %v455_v60 = vpop.permute.xlu0 %454  ;;  %v457_v62 = vpop.permute.xlu1 %456  ;;  %v220_v2 = vmul.f32 %v217_v47, %v829_v59  ;;  %v219_v20 = vmul.f32 %v217_v47, %v831_v61  ;;  %v263_v23 = vmul.f32 %v807_v50, %v831_v61  ;;  %v264_v58 = vmul.f32 %v807_v50, %v829_v59 }
 0x11d   :  { %v459_v13 = vsel %vm163_vm0, %v457_v62, %v455_v60  ;;  %v458_v4 = vsel %vm163_vm0, %v455_v60, %v457_v62 }
 0x11e   :  { %v842_v5 = vmul.f32 %v459_v13, %v180_v56  ;;  %v461_v24 = vmul.f32 %v458_v4, %v184_v53  ;;  %v228_v26 = vadd.f32 %v226_v8, %v220_v2  ;;  %v227_v30 = vadd.f32 %v225_v10, %v219_v20 }
 0x11f   :  { %v271_v6 = vadd.f32 %v269_v32, %v263_v23  ;;  %v492_v56 = vmul.f32 %v777_v41, %v800_v48 }
 0x120   :  { %v188_v3 = vpop.permute.xlu0 %187  ;;  %v190_v7 = vpop.permute.xlu1 %189  ;;  %v470_v27 = vmul.f32 %v842_v5, %v217_v47  ;;  %v471_v44 = vmul.f32 %v461_v24, %v217_v47  ;;  %v490_v52 = vmul.f32 %v842_v5, %v807_v50  ;;  %v491_v13 = vmul.f32 %v461_v24, %v807_v50 }
 0x121   :  { %v192_v9 = vsel %vm191_vm1, %v188_v3, %v190_v7  ;;  %v193_v19 = vsel %vm191_vm1, %v190_v7, %v188_v3  ;;  %v272_v3 = vadd.f32 %v270_v45, %v264_v58 }
 0x122   :  { %v852_v12 = vmul.f32 %v207_v63, %v192_v9  ;;  %v854_v15 = vmul.f32 %v211_v0, %v193_v19  ;;  %v474_v53 = vadd.f32 %v472_v16, %v470_v27  ;;  %v494_v60 = vadd.f32 %v492_v56, %v490_v52 }
 0x123   :  { %v475_v62 = vadd.f32 %v473_v55, %v471_v44  ;;  %v291_v44 = vrot.slane %v805_v49, %v725_v17 }
 0x124   :  { %v463_v25 = vpop.permute.xlu0 %462  ;;  %v465_v28 = vpop.permute.xlu1 %464  ;;  %v234_v29 = vmul.f32 %v798_v46, %v854_v15  ;;  %v233_v31 = vmul.f32 %v798_v46, %v852_v12  ;;  %v277_v35 = vmul.f32 %v809_v1, %v852_v12  ;;  %v278_v2 = vmul.f32 %v809_v1, %v854_v15 }
 0x125   :  { %v466_v33 = vsel %vm191_vm1, %v463_v25, %v465_v28  ;;  %v467_v34 = vsel %vm191_vm1, %v465_v28, %v463_v25 }
 0x126   :  { %v468_v36 = vmul.f32 %v466_v33, %v207_v63  ;;  %v469_v39 = vmul.f32 %v467_v34, %v211_v0  ;;  %v236_v40 = vadd.f32 %v234_v29, %v228_v26  ;;  %v235_v43 = vadd.f32 %v233_v31, %v227_v30 }
 0x127   :  { %v279_v57 = vadd.f32 %v277_v35, %v271_v6  ;;  %v280_v4 = vadd.f32 %v278_v2, %v272_v3  ;;  %v295_v6 = vrot.slane %v805_v49, %v727_v18 }
 0x128   :  { %283 = vrot.lane.b32.xlu1 %v236_v40, %s649_s4  ;;  %281 = vrot.lane.b32.xlu0 %v235_v43, %s649_s4  ;;  %v476_v54 = vmul.f32 %v468_v36, %v798_v46  ;;  %v496_v47 = vmul.f32 %v468_v36, %v809_v1  ;;  %v477_v14 = vmul.f32 %v469_v39, %v798_v46 }
 0x129   :  { %v493_v46 = vmul.f32 %v779_v42, %v800_v48  ;;  %v497_v20 = vmul.f32 %v469_v39, %v809_v1 }
 0x12a   :  { %v478_v11 = vadd.f32 %v476_v54, %v474_v53  ;;  %v498_v63 = vadd.f32 %v496_v47, %v494_v60  ;;  %v479_v0 = vadd.f32 %v477_v14, %v475_v62  ;;  %v305_v53 = vrot.slane %v295_v6, %v725_v17 }
 0x12b   :  { %v495_v7 = vadd.f32 %v493_v46, %v491_v13 }
 0x12c   :  { %310 = vrot.lane.b32.xlu0 %v279_v57, %s650_s5  ;;  %500 = vrot.lane.b32.xlu1 %v478_v11, %s649_s4 }
 0x12d   :  { %v499_v9 = vadd.f32 %v497_v20, %v495_v7 }
 0x130   :  { %510 = vrot.lane.b32.xlu0 %v498_v63, %s650_s5  ;;  %502 = vrot.lane.b32.xlu1 %v479_v0, %s649_s4 }
 0x134   :  { %312 = vrot.lane.b32.xlu1 %v280_v4, %s650_s5 }
 0x135   :  { %v239_v8 = vpop.permute.xlu0 %238  ;;  %v245_v19 = vpop.permute.xlu1 %244 }
 0x136   :  { %v241_v50 = vmul.f32 %v239_v8, %v831_v61  ;;  %v242_v10 = vmul.f32 %v239_v8, %v829_v59  ;;  %v480_v16 = vmul.f32 %v842_v5, %v239_v8  ;;  %v481_v23 = vmul.f32 %v461_v24, %v239_v8 }
 0x137   :  { %v247_v48 = vmul.f32 %v245_v19, %v769_v37  ;;  %v248_v25 = vmul.f32 %v245_v19, %v771_v38  ;;  %v482_v26 = vmul.f32 %v777_v41, %v245_v19  ;;  %v483_v1 = vmul.f32 %v779_v42, %v245_v19 }
 0x138   :  { %512 = vrot.lane.b32.xlu1 %v499_v9, %s650_s5 }
 0x139   :  { %v249_v27 = vadd.f32 %v247_v48, %v241_v50  ;;  %v250_v28 = vadd.f32 %v248_v25, %v242_v10  ;;  %v484_v29 = vadd.f32 %v482_v26, %v480_v16  ;;  %v485_v30 = vadd.f32 %v483_v1, %v481_v23 }
 0x13a   :  { %v253_v31 = vpop.permute.xlu1 %252  ;;  %v342_v40 = vpop.permute.xlu0 %341 }
 0x13b   :  { %v255_v61 = vmul.f32 %v253_v31, %v852_v12  ;;  %v256_v59 = vmul.f32 %v253_v31, %v854_v15  ;;  %v486_v5 = vmul.f32 %v468_v36, %v253_v31  ;;  %v487_v24 = vmul.f32 %v469_v39, %v253_v31 }
 0x13c   :  { %v320_v15 = vrot.slane %v805_v49, %v733_v21  ;;  %v324_v36 = vrot.slane %v805_v49, %v735_v22  ;;  %v301_v39 = vrot.slane %v291_v44, %v725_v17 }
 0x13d   :  { %v257_v32 = vadd.f32 %v255_v61, %v249_v27  ;;  %v258_v33 = vadd.f32 %v256_v59, %v250_v28  ;;  %v488_v34 = vadd.f32 %v486_v5, %v484_v29  ;;  %v489_v35 = vadd.f32 %v487_v24, %v485_v30 }
 0x13e   :  { %v330_v56 = vrot.slane %v320_v15, %v733_v21  ;;  %v334_v57 = vrot.slane %v324_v36, %v733_v21 }
 0x19a   :  { %v284_v43 = vpop.permute.xlu1 %283  ;;  %v282_v52 = vpop.permute.xlu0 %281 }
 0x19b   :  { %v286_v54 = vsel %vm285_vm2, %v282_v52, %v284_v43  ;;  %v287_v18 = vsel %vm285_vm2, %v284_v43, %v282_v52 }
 0x19c   :  { %v306_v11 = vmul.f32 %v301_v39, %v287_v18  ;;  %v307_v47 = vmul.f32 %v305_v53, %v286_v54 }
 0x19e   :  { %v501_v12 = vpop.permute.xlu1 %500  ;;  %v311_v22 = vpop.permute.xlu0 %310  ;;  %v308_v13 = vadd.f32 %v306_v11, %v257_v32  ;;  %v309_v21 = vadd.f32 %v307_v47, %v258_v33 }
 0x1a2   :  { %v503_v55 = vpop.permute.xlu1 %502  ;;  %v511_v2 = vpop.permute.xlu0 %510 }
 0x1a3   :  { %v504_v49 = vsel %vm285_vm2, %v501_v12, %v503_v55  ;;  %v505_v17 = vsel %vm285_vm2, %v503_v55, %v501_v12 }
 0x1a4   :  { %v506_v58 = vmul.f32 %v505_v17, %v301_v39  ;;  %v507_v60 = vmul.f32 %v504_v49, %v305_v53 }
 0x1a6   :  { %v313_v14 = vpop.permute.xlu1 %312  ;;  %v508_v4 = vadd.f32 %v506_v58, %v488_v34  ;;  %v509_v7 = vadd.f32 %v507_v60, %v489_v35 }
 0x1a7   :  { %v315_v62 = vsel %vm314_vm3, %v311_v22, %v313_v14  ;;  %v316_v45 = vsel %vm314_vm3, %v313_v14, %v311_v22 }
 0x1a8   :  { %v335_v63 = vmul.f32 %v330_v56, %v315_v62  ;;  %v336_v0 = vmul.f32 %v334_v57, %v316_v45 }
 0x1aa   :  { %v337_v46 = vadd.f32 %v335_v63, %v308_v13  ;;  %v338_v3 = vadd.f32 %v336_v0, %v309_v21  ;;  %v513_v20 = vpop.permute.xlu1 %512 }
 0x1ab   :  { %v514_v8 = vsel %vm314_vm3, %v511_v2, %v513_v20  ;;  %v515_v9 = vsel %vm314_vm3, %v513_v20, %v511_v2 }
 0x1ac   :  { %v344_v19 = vadd.f32 %v342_v40, %v337_v46  ;;  %v345_v50 = vadd.f32 %v342_v40, %v338_v3  ;;  %v516_v10 = vmul.f32 %v514_v8, %v330_v56  ;;  %v517_v16 = vmul.f32 %v515_v9, %v334_v57 }
 0x1ae   :  { %v346_v23 = vmax.f32 %v344_v19, 0.0  ;;  %v347_v48 = vmax.f32 %v345_v50, 0.0  ;;  %v518_v25 = vadd.f32 %v516_v10, %v508_v4  ;;  %v519_v26 = vadd.f32 %v517_v16, %v509_v7 }
 0x1b0   :  { %v348_v1 = vmin.f32 %v346_v23, 6.0  ;;  %v349_v27 = vmin.f32 %v347_v48, 6.0  ;;  %v520_v28 = vadd.f32 %v518_v25, %v342_v40  ;;  %v521_v29 = vadd.f32 %v519_v26, %v342_v40 }
 0x1b2   :  { %v352_v30 = vrot.slane %v348_v1, 4  ;;  %v353_v31 = vrot.slane %v349_v27, 4  ;;  %v522_v61 = vmax.f32 %v520_v28, 0.0  ;;  %v523_v59 = vmax.f32 %v521_v29, 0.0 }
 0x1b4   :  { %v357_v51 = vsel %vm356_vm4, %v769_v37, %v352_v30  ;;  %v358_v5 = vsel %vm356_vm4, %v771_v38, %v353_v31  ;;  %v524_v24 = vmin.f32 %v522_v61, 6.0  ;;  %v525_v32 = vmin.f32 %v523_v59, 6.0 }
 0x1b5   :  { %359 = vst [vmem:[#allocation5] sm:$0xff] %v357_v51  ;;  %360 = vst [vmem:[#allocation5 + $0x8] sm:$0xff] %v358_v5 }
 0x1b6   :  { %v528_v33 = vrot.slane %v524_v24, 4  ;;  %v529_v34 = vrot.slane %v525_v32, 4 }
 0x1b8   :  { %v532_v35 = vsel %vm356_vm4, %v777_v41, %v528_v33  ;;  %v533_v40 = vsel %vm356_vm4, %v779_v42, %v529_v34 }
 0x1b9   :  { %535 = vst [vmem:[#allocation5 + $0x10] sm:$0xff] %v532_v35  ;;  %536 = vst [vmem:[#allocation5 + $0x18] sm:$0xff] %v533_v40 }
 0x1ba   :  { %620 = shalt.err (!%p617_p12)
}
 0x1bb   :  { %s621_s24 = scalar_lea.hbm %s958_s6, 512 }
 0x1bc   :  { %p622_p13 = scmp.ne.s32.totalorder %s958_s6, %s621_s24  ;;  %p625_p0 = scmp.lt.u32.totalorder %s621_s24, %s958_s6 }
 0x1be   :  { %p627_p1 = pnand %p625_p0, %p622_p13 }
 0x1c0   :  { %630 = shalt.err (!%p627_p1)
}
 0x1c1   :  { %s652_s29 = smov 256  }
 0x1c2   :  { %548 = dma.vmem_to_hbm [thread:$0]  %s543_s20, 512, %s958_s6, [#allocation4], %s652_s29, %s652_s29, %s646_s1  }
 0x1c3   :  { %633 = dma.done.wait [#allocation4], 512  }
 0x1c4   :  { %634 = vsyncadd [#allocation4], 4294966784 }
 0x1c5   :  { %552 = vsyncpa [#allocation3], 1 }
 0x1c6   :  { %553 = vsyncpa [#allocation4], 1 }

</bundles_post_ra>
